<compile_context>
chip_gen: v7x
topology: tpu7x:2x2x1
jax: 0.10.0
libtpu: 0.0.40
codegen_flags: <defaults>
</compile_context>

<pallas_src>
import jax
import jax.numpy as jnp
from jax import lax
from jax.experimental import pallas as pl
from jax.experimental.pallas import tpu as pltpu

BN_EPS = 1e-5          # nn.BatchNorm1d default
NEG_SLOPE = 0.01       # nn.LeakyReLU(negative_slope=0.01)
LANE = 128


def _single_fc_kernel(x_ref, w_ref, p_ref, o_ref):
    # Linear (bias omitted: it cancels exactly under batch-stat BatchNorm).
    h = jnp.dot(x_ref[...], w_ref[...], preferred_element_type=jnp.float32)

    # BatchNorm1d, training-mode forward: biased variance over the batch axis.
    n = h.shape[0]
    inv_n = 1.0 / n
    mean = jnp.sum(h, axis=0, keepdims=True) * inv_n
    centered = h - mean
    var = jnp.sum(centered * centered, axis=0, keepdims=True) * inv_n

    # gamma folded into the rsqrt scale (rsqrt runs on the EUP slot).
    p = p_ref[...]                      # (2, tn): row 0 = gamma, row 1 = beta
    gamma = p[0:1, :]
    beta = p[1:2, :]
    scale = gamma * lax.rsqrt(var + BN_EPS)
    h_bn = centered * scale + beta

    # LeakyReLU(0.01)
    o_ref[...] = jnp.where(h_bn >= 0, h_bn, NEG_SLOPE * h_bn).astype(o_ref.dtype)


def single_fully_connected(x, w, b=None, gamma=None, beta=None, *, tn=None):
    """Fused Linear -> BatchNorm1d(batch stats) -> LeakyReLU.

    x: (N, D_in) f32; w: (D_in, D_out) (nn.Linear weight pre-transposed);
    b: (D_out,) or None — accepted for API parity but NOT used: a per-feature
       constant bias is exactly cancelled by the batch-mean subtraction in BN;
    gamma, beta: (D_out,) BN affine params (default 1 / 0).
    """
    del b  # exact: bias cancels under batch-statistics BatchNorm
    N, D_in = x.shape
    D_out = w.shape[1]
    if gamma is None:
        gamma = jnp.ones((D_out,), jnp.float32)
    if beta is None:
        beta = jnp.zeros((D_out,), jnp.float32)

    # Pad the feature axis to a lane-dense multiple of 128 (zero pad is inert
    # through BN because padded columns stay exactly zero).
    D_pad = ((D_out + LANE - 1) // LANE) * LANE
    pad = D_pad - D_out
    if pad:
        w = jnp.pad(w, ((0, 0), (0, pad)))
        gamma = jnp.pad(gamma, (0, pad))
        beta = jnp.pad(beta, (0, pad))
    params = jnp.stack([gamma, beta], axis=0)  # (2, D_pad): one input, one DMA

    # Feature-tile size: multiple of 128 that divides D_pad, capped at 512 so
    # per-block VMEM (double-buffered x/w/params/out) stays well inside the
    # smallest scoped-VMEM budget (v5e 16 MiB) for realistic D_in.
    if tn is None:
        tn = LANE
        for cand in (512, 384, 256, 128):
            if D_pad % cand == 0:
                tn = cand
                break
    assert D_pad % tn == 0 and tn % LANE == 0

    grid = (D_pad // tn,)

    out_padded = pl.pallas_call(
        _single_fc_kernel,
        out_shape=jax.ShapeDtypeStruct((N, D_pad), jnp.float32),
        grid_spec=pltpu.PrefetchScalarGridSpec(
            num_scalar_prefetch=0,
            grid=grid,
            in_specs=[
                # x: same block for every feature tile -> DMA'd once.
                pl.BlockSpec((N, D_in), lambda j: (0, 0)),
                # weight tile for this group of features.
                pl.BlockSpec((D_in, tn), lambda j: (0, j)),
                # packed (gamma, beta) tile.
                pl.BlockSpec((2, tn), lambda j: (0, j)),
            ],
            out_specs=pl.BlockSpec((N, tn), lambda j: (0, j)),
        ),
        compiler_params=pltpu.CompilerParams(
            # Feature tiles are independent (BN stats are per-feature), so this
            # axis is truly parallel -> sharded across TensorCores on v7x.
            dimension_semantics=("parallel",),
        ),
    )(x, w, params)

    return out_padded[:, :D_out] if pad else out_padded


def _reference(x, w, b, gamma, beta):
    h = x @ w + b
    mean = h.mean(axis=0, keepdims=True)
    var = ((h - mean) ** 2).mean(axis=0, keepdims=True)
    h = (h - mean) / jnp.sqrt(var + BN_EPS) * gamma + beta
    return jnp.where(h >= 0, h, NEG_SLOPE * h)


if __name__ == "__main__":
    key = jax.random.PRNGKey(0)

    # Case 1: the original toy shape (output narrower than a lane -> padded path).
    N, D_in, D_out = 8, 32, 16
    kx, kw, kb, k2 = jax.random.split(key, 4)
    x = jax.random.normal(kx, (N, D_in), dtype=jnp.float32)
    bound = 1.0 / (D_in ** 0.5)
    w = jax.random.uniform(kw, (D_in, D_out), jnp.float32, -bound, bound)
    b = jax.random.uniform(kb, (D_out,), jnp.float32, -bound, bound)
    gamma = jnp.ones((D_out,), jnp.float32)
    beta = jnp.zeros((D_out,), jnp.float32)

    out = jax.block_until_ready(single_fully_connected(x, w, b, gamma, beta))
    ref = _reference(x, w, b, gamma, beta)
    assert out.shape == (N, D_out)
    assert jnp.allclose(out, ref, atol=1e-4, rtol=1e-4), "mismatch vs reference (case 1)"

    # Case 2: wider output to exercise the multi-tile (grid > 1) parallel path.
    D_out2 = 256
    kw2, kb2, kg2, kbe2 = jax.random.split(k2, 4)
    w2 = jax.random.uniform(kw2, (D_in, D_out2), jnp.float32, -bound, bound)
    b2 = jax.random.uniform(kb2, (D_out2,), jnp.float32, -bound, bound)
    g2 = jax.random.uniform(kg2, (D_out2,), jnp.float32, 0.5, 1.5)
    be2 = jax.random.uniform(kbe2, (D_out2,), jnp.float32, -0.5, 0.5)

    out2 = jax.block_until_ready(
        single_fully_connected(x, w2, b2, g2, be2, tn=128)
    )
    ref2 = _reference(x, w2, b2, g2, be2)
    assert out2.shape == (N, D_out2)
    assert jnp.allclose(out2, ref2, atol=1e-4, rtol=1e-4), "mismatch vs reference (case 2)"

    print("KERNEL_OK")
</pallas_src>

<mosaic_0001>
module attributes {stable_mosaic.version = 11 : i64} {
  func.func @_single_fc_kernel(%arg0: i32, %arg1: memref<8x32xf32, #tpu.memory_space<vmem>>, %arg2: memref<32x128xf32, #tpu.memory_space<vmem>>, %arg3: memref<2x128xf32, #tpu.memory_space<vmem>>, %arg4: memref<8x128xf32, #tpu.memory_space<vmem>>) attributes {dimension_semantics = [#tpu.dimension_semantics<parallel>], iteration_bounds = array<i64: 1>, scalar_prefetch = 0 : i64, scratch_operands = 0 : i64, tpu.core_type = #tpu.core_type<tc>, window_params = [{pipeline_mode = #tpu.pipeline_mode<synchronous>, transform_indices = @transform_0, window_bounds = array<i64: 8, 32>}, {transform_indices = @transform_1, window_bounds = array<i64: 32, 128>}, {transform_indices = @transform_2, window_bounds = array<i64: 2, 128>}, {transform_indices = @transform_3, window_bounds = array<i64: 8, 128>}]} {
    %c0 = arith.constant 0 : index
    %c0_0 = arith.constant 0 : index
    %0 = vector.load %arg1[%c0, %c0_0] : memref<8x32xf32, #tpu.memory_space<vmem>>, vector<8x32xf32>
    %c0_1 = arith.constant 0 : index
    %c0_2 = arith.constant 0 : index
    %1 = vector.load %arg2[%c0_1, %c0_2] : memref<32x128xf32, #tpu.memory_space<vmem>>, vector<32x128xf32>
    %cst = arith.constant dense<0.000000e+00> : vector<8x128xf32>
    %2 = tpu.matmul %0, %1, %cst {dimension_numbers = #tpu.dot_dimension_numbers<[1], [0], [0], [1], [0, 0, 1, 1], [], []>} : vector<8x32xf32>, vector<32x128xf32>, vector<8x128xf32> -> vector<8x128xf32>
    %cst_3 = arith.constant dense<0.000000e+00> : vector<128xf32>
    %3 = vector.multi_reduction <add>, %2, %cst_3 [0] : vector<8x128xf32> to vector<128xf32>
    %4 = vector.shape_cast %3 : vector<128xf32> to vector<1x128xf32>
    %cst_4 = arith.constant 1.250000e-01 : f32
    %5 = vector.broadcast %cst_4 : f32 to vector<1x128xf32>
    %6 = arith.mulf %4, %5 : vector<1x128xf32>
    %7 = vector.broadcast %6 : vector<1x128xf32> to vector<8x128xf32>
    %8 = arith.subf %2, %7 : vector<8x128xf32>
    %9 = arith.mulf %8, %8 : vector<8x128xf32>
    %cst_5 = arith.constant dense<0.000000e+00> : vector<128xf32>
    %10 = vector.multi_reduction <add>, %9, %cst_5 [0] : vector<8x128xf32> to vector<128xf32>
    %11 = vector.shape_cast %10 : vector<128xf32> to vector<1x128xf32>
    %cst_6 = arith.constant 1.250000e-01 : f32
    %12 = vector.broadcast %cst_6 : f32 to vector<1x128xf32>
    %13 = arith.mulf %11, %12 : vector<1x128xf32>
    %c0_7 = arith.constant 0 : index
    %c0_8 = arith.constant 0 : index
    %14 = vector.load %arg3[%c0_7, %c0_8] : memref<2x128xf32, #tpu.memory_space<vmem>>, vector<2x128xf32>
    %15 = vector.extract_strided_slice %14 {offsets = [0, 0], sizes = [1, 128], strides = [1, 1]} : vector<2x128xf32> to vector<1x128xf32>
    %16 = vector.extract_strided_slice %14 {offsets = [1, 0], sizes = [1, 128], strides = [1, 1]} : vector<2x128xf32> to vector<1x128xf32>
    %cst_9 = arith.constant 9.99999974E-6 : f32
    %17 = vector.broadcast %cst_9 : f32 to vector<1x128xf32>
    %18 = arith.addf %13, %17 : vector<1x128xf32>
    %19 = math.rsqrt %18 : vector<1x128xf32>
    %20 = arith.mulf %15, %19 : vector<1x128xf32>
    %21 = vector.broadcast %20 : vector<1x128xf32> to vector<8x128xf32>
    %22 = arith.mulf %8, %21 : vector<8x128xf32>
    %23 = vector.broadcast %16 : vector<1x128xf32> to vector<8x128xf32>
    %24 = arith.addf %22, %23 : vector<8x128xf32>
    %cst_10 = arith.constant 0.000000e+00 : f32
    %25 = vector.broadcast %cst_10 : f32 to vector<8x128xf32>
    %26 = arith.cmpf oge, %24, %25 : vector<8x128xf32>
    %cst_11 = arith.constant 0.00999999977 : f32
    %27 = vector.broadcast %cst_11 : f32 to vector<8x128xf32>
    %28 = arith.mulf %27, %24 : vector<8x128xf32>
    %29 = arith.select %26, %24, %28 : vector<8x128xi1>, vector<8x128xf32>
    %c0_12 = arith.constant 0 : index
    %c0_13 = arith.constant 0 : index
    %30 = vector.load %arg4[%c0_12, %c0_13] : memref<8x128xf32, #tpu.memory_space<vmem>>, vector<8x128xf32>
    tpu.vector_store %arg4[%c0_12, %c0_13], %29 {strides = array<i32>} : memref<8x128xf32, #tpu.memory_space<vmem>>, vector<8x128xf32>,
    return
  }
  func.func @transform_0(%arg0: i32) -> (i32, i32) {
    %c0_i32 = arith.constant 0 : i32
    %c0_i32_0 = arith.constant 0 : i32
    %c0_i32_1 = arith.constant 0 : i32
    return %c0_i32, %c0_i32_0 : i32, i32
  }
  func.func @transform_1(%arg0: i32) -> (i32, i32) {
    %c0_i32 = arith.constant 0 : i32
    %c0_i32_0 = arith.constant 0 : i32
    return %c0_i32, %arg0 : i32, i32
  }
  func.func @transform_2(%arg0: i32) -> (i32, i32) {
    %c0_i32 = arith.constant 0 : i32
    %c0_i32_0 = arith.constant 0 : i32
    return %c0_i32, %arg0 : i32, i32
  }
  func.func @transform_3(%arg0: i32) -> (i32, i32) {
    %c0_i32 = arith.constant 0 : i32
    %c0_i32_0 = arith.constant 0 : i32
    return %c0_i32, %arg0 : i32, i32
  }
}

</mosaic_0001>

<bundles_post_ra>
// kernel: tpu_custom_call.1
= control target key start
LH: loop header
LB: loop body
LE: loop exit
PB: predicated region body
PF: predicated region fallthrough
CT: control target
= control target key end

     0   :  { %8 = vsyncpa [#allocation3], 0  ;;  %s349_s0 = inlined_call_operand.hbm [shape: f32[8,32], index: 0, kind: input, shape index: {}]   ;;  %s350_s1 = inlined_call_operand.hbm [shape: f32[32,128], index: 1, kind: input, shape index: {}]   ;;  %s351_s2 = inlined_call_operand.vmem [shape: f32[2,128], index: 2, kind: input, shape index: {}]   ;;  %s352_s3 = inlined_call_operand.hbm [shape: f32[8,128], index: 3, kind: output, shape index: {}]  }
   0x1   :  { %9 = vsyncpa [#allocation6], 0 }
   0x2   :  { %10 = vsyncpa [#allocation4], 0  ;;  %s275_s12 = smov [#allocation2]   ;;  %s276_s14 = smov [#allocation5]  }
   0x3   :  { %s17_s13 = sshll.u32 %s275_s12, 4  ;;  %s26_s15 = sshll.u32 %s276_s14, 4  ;;  %s18_s13 = int_to_ptr.vmem [resolvable:$true] %s17_s13  ;;  %s303_s15 = int_to_ptr.vmem [resolvable:$true] %s26_s15 }
   0x4   :  { %s203_s18 = scalar_lea.hbm %s349_s0, 128 }
   0x5   :  { %p204_p0 = scmp.ne.s32.totalorder %s349_s0, %s203_s18  ;;  %p207_p1 = scmp.lt.u32.totalorder %s203_s18, %s349_s0 }
   0x7   :  { %p209_p2 = pnand %p207_p1, %p204_p0 }
   0x9   :  { %212 = shalt.err (!%p209_p2)
}
   0xa   :  { %s213_s23 = scalar_lea.vmem %s18_s13, 128  ;;  %p218_p4 = scmp.lt.s32.totalorder %s18_s13, %s18_s13 }
   0xb   :  { %p214_p3 = scmp.ne.s32.totalorder %s18_s13, %s213_s23  ;;  %p219_p5 = scmp.lt.s32.totalorder %s213_s23, %s213_s23 }
   0xd   :  { %p220_p6 = por %p219_p5, %p218_p4 }
   0xf   :  { %p221_p7 = pnand %p220_p6, %p214_p3 }
  0x11   :  { %224 = shalt.err (!%p221_p7)
}
  0x12   :  { %20 = dma.hbm_to_vmem [thread:$0]  %s349_s0, 128, %s18_s13, [#allocation3]  }
  0x13   :  { %s225_s28 = scalar_lea.hbm %s350_s1, 512 }
  0x14   :  { %p226_p8 = scmp.ne.s32.totalorder %s350_s1, %s225_s28  ;;  %p229_p9 = scmp.lt.u32.totalorder %s225_s28, %s350_s1 }
  0x16   :  { %p231_p10 = pnand %p229_p9, %p226_p8 }
  0x18   :  { %234 = shalt.err (!%p231_p10)
}
  0x19   :  { %s235_s6 = scalar_lea.vmem %s303_s15, 512  ;;  %p240_p12 = scmp.lt.s32.totalorder %s303_s15, %s303_s15 }
  0x1a   :  { %p236_p11 = scmp.ne.s32.totalorder %s303_s15, %s235_s6  ;;  %p241_p13 = scmp.lt.s32.totalorder %s235_s6, %s235_s6 }
  0x1c   :  { %p242_p0 = por %p241_p13, %p240_p12 }
  0x1e   :  { %p243_p1 = pnand %p242_p0, %p236_p11 }
  0x20   :  { %246 = shalt.err (!%p243_p1)
}
  0x21   :  { %s277_s0 = smov 128   ;;  %s278_s7 = smov 8  }
  0x22   :  { %32 = dma.hbm_to_vmem [thread:$0]  %s350_s1, 512, %s303_s15, [#allocation6], %s277_s0, %s277_s0, %s278_s7  }
  0x23   :  { %269 = dma.done.wait [#allocation3], 128  }
  0x24   :  { %270 = vsyncadd [#allocation3], 4294967168 }
  0x25   :  { %271 = dma.done.wait [#allocation6], 512  }
  0x26   :  { %272 = vsyncadd [#allocation6], 4294966784  ;;  %v279_v0 = vmov 0.0|0.0   ;;  %vm280_vm0 = vmmov 0   ;;  %v281_v1 = vmov 0.0   ;;  %v42_v2 = vld [vmem:[#allocation5] sm:$0xff]  ;;  %v140_v28 = vlaneseq }
  0x27   :  { %187 = vmatprep.subr.bf16.mxu0 %v279_v0  ;;  %184 = vmatprep.mubr.msk.f32.mxu0 %vm280_vm0, %v281_v1  ;;  %v43_v3 = vld [vmem:[#allocation5 + $0x8] sm:$0xff]  ;;  %v44_v4 = vld [vmem:[#allocation5 + $0x10] sm:$0xff]  ;;  %v45_v6 = vld [vmem:[#allocation5 + $0x18] sm:$0xff]  ;;  %vm46_vm1 = vcmask 261120   ;;  %s282_s11 = smov [#allocation7]  }
  0x28   :  { %v188_v5 = vpack.c.bf16 %v43_v3, %v42_v2  ;;  %v191_v7 = vpack.c.bf16 %v45_v6, %v44_v4  ;;  %v41_v8 = vld [vmem:[#allocation2] sm:$0xff]  ;;  %v141_v29 = vshrl.u32 %v140_v28, 7  ;;  %s160_s12 = sshll.u32 %s282_s11, 4  ;;  %s161_s12 = int_to_ptr.vmem [resolvable:$true] %s160_s12 }
  0x29   :  { %v136_v30 = vld [vmem:[%s351_s2] sm:$0x3]  ;;  %s247_s13 = scalar_lea.vmem %s161_s12, 128  ;;  %p252_p3 = scmp.lt.s32.totalorder %s161_s12, %s161_s12 }
  0x2a   :  { %189 = vmatpush3.bf16.msra.mxu0 %v188_v5  ;;  %v142_v31 = vsub.s32 0, %v141_v29  ;;  %v147_v32 = vsub.s32 1, %v141_v29  ;;  %p248_p2 = scmp.ne.s32.totalorder %s161_s12, %s247_s13  ;;  %p253_p4 = scmp.lt.s32.totalorder %s247_s13, %s247_s13 }
  0x2b   :  { %190 = vmatprep.subr.bf16.mxu0 %v279_v0 }
  0x2c   :  { %v148_v36 = vrot.slane %v136_v30, %v147_v32  ;;  %p254_p5 = por %p253_p4, %p252_p3 }
  0x2e   :  { %192 = vmatpush3.bf16.msra.mxu0 %v191_v7  ;;  %p255_p6 = pnand %p254_p5, %p248_p2 }
  0x31   :  { %185 = vmatmul.mubr.msk.f32.vlgmr.msra.gmra.mrb[0].mxu0 %vm46_vm1, %v41_v8 }
 0x104   :  { %v116_v9 = vpop.f32.mrb[0].mxu0 }
 0x105   :  { %v120_v10 = vrot.slane %v116_v9, 4  ;;  %v186_v11 = vpop.f32.mrb[1].mxu0 }
 0x107   :  { %v121_v12 = vadd.f32 %v120_v10, %v116_v9 }
 0x109   :  { %v122_v13 = vrot.slane %v121_v12, 2 }
 0x10b   :  { %v123_v14 = vadd.f32 %v122_v13, %v121_v12 }
 0x10d   :  { %v124_v15 = vrot.slane %v123_v14, 1 }
 0x10f   :  { %v125_v16 = vadd.f32 %v124_v15, %v123_v14 }
 0x111   :  { %v126_v17 = vmul.f32 0.125, %v125_v16 }
 0x113   :  { %v127_v18 = vsub.f32 %v116_v9, %v126_v17 }
 0x115   :  { %v128_v19 = vmul.f32 %v127_v18, %v127_v18 }
 0x117   :  { %v129_v20 = vrot.slane %v128_v19, 4 }
 0x119   :  { %v130_v21 = vadd.f32 %v129_v20, %v128_v19 }
 0x11b   :  { %v131_v22 = vrot.slane %v130_v21, 2 }
 0x11d   :  { %v132_v23 = vadd.f32 %v131_v22, %v130_v21 }
 0x11f   :  { %v133_v24 = vrot.slane %v132_v23, 1 }
 0x121   :  { %v134_v25 = vadd.f32 %v133_v24, %v132_v23 }
 0x123   :  { %v135_v26 = vmul.f32 0.125, %v134_v25 }
 0x125   :  { %v137_v27 = vadd.f32 1e-05, %v135_v26 }
 0x127   :  { %201 = vrsqrt.f32 %v137_v27 }
 0x131   :  { %v202_v33 = vpop.eup %201 }
 0x132   :  { %v139_v34 = vmul.f32 %v202_v33, %v136_v30 }
 0x134   :  { %v143_v35 = vrot.slane %v139_v34, %v142_v31 }
 0x136   :  { %v144_v37 = vmul.f32 %v143_v35, %v127_v18 }
 0x138   :  { %v149_v38 = vadd.f32 %v148_v36, %v144_v37 }
 0x13a   :  { %vm150_vm2 = vcmp.ge.f32.partialorder %v149_v38, 0.0  ;;  %v151_v39 = vmul.f32 0.01, %v149_v38 }
 0x13c   :  { %v152_v40 = vsel %vm150_vm2, %v149_v38, %v151_v39 }
 0x13d   :  { %153 = vst [vmem:[#allocation7] sm:$0xff] %v152_v40 }
 0x13e   :  { %258 = shalt.err (!%p255_p6)
}
 0x13f   :  { %s259_s15 = scalar_lea.hbm %s352_s3, 128 }
 0x140   :  { %p260_p7 = scmp.ne.s32.totalorder %s352_s3, %s259_s15  ;;  %p263_p8 = scmp.lt.u32.totalorder %s259_s15, %s352_s3 }
 0x142   :  { %p265_p9 = pnand %p263_p8, %p260_p7 }
 0x144   :  { %268 = shalt.err (!%p265_p9)
}
 0x145   :  { %163 = dma.vmem_to_hbm [thread:$0]  %s161_s12, 128, %s352_s3, [#allocation4]  }
 0x146   :  { %273 = dma.done.wait [#allocation4], 128  }
 0x147   :  { %274 = vsyncadd [#allocation4], 4294967168 }
 0x148   :  { %167 = vsyncpa [#allocation3], 1 }
 0x149   :  { %168 = vsyncpa [#allocation6], 1 }
 0x14a   :  { %169 = vsyncpa [#allocation4], 1 }

</bundles_post_ra>
